<compile_context>
chip_gen: v5e
topology: v5e:2x2
jax: 0.10.0
libtpu: 0.0.40
codegen_flags: <defaults>
</compile_context>

<pallas_src>
import functools

import jax
import jax.numpy as jnp
import numpy as np
from jax.experimental import pallas as pl
from jax.experimental.pallas import tpu as pltpu


def _fused_softmax(v2d, w_eff, b_eff, *, sz_b, seq_len, n_head):
    """All-heads attention weights, batch-major: returns (sz_b, n_head, seq_len)."""
    # Single MXU matmul over all heads; w_eff / b_eff already carry 1/temperature.
    logits = jnp.dot(v2d, w_eff, preferred_element_type=jnp.float32) + b_eff  # (B*S, H)
    logits = logits.reshape(sz_b, seq_len, n_head)      # leading-dim split only (free)
    # Numerically-stable softmax over seq_len (axis=1).
    m = jnp.max(logits, axis=1, keepdims=True)
    p = jnp.exp(logits - m)
    denom = jnp.sum(p, axis=1, keepdims=True)
    inv = pl.reciprocal(denom, approx=True)             # EUP slot (otherwise idle)
    inv = inv * (2.0 - denom * inv)                     # one Newton step -> f32 accuracy
    attn = p * inv                                      # (B, S, H)
    # Swap the minor dims so seq_len sits in the lane dimension for the store
    # (and per-head rows become cheap sublane slices in the weight_v kernel).
    return jnp.transpose(attn, (0, 2, 1))               # (B, H, S)


def _attn_kernel(v2d_ref, weff_ref, beff_ref, attn_ref, *, sz_b, seq_len, n_head):
    attn = _fused_softmax(v2d_ref[...], weff_ref[...], beff_ref[...],
                          sz_b=sz_b, seq_len=seq_len, n_head=n_head)
    attn_ref[...] = attn.astype(attn_ref.dtype)


def _attn_weighted_kernel(v2d_ref, weff_ref, beff_ref, attn_ref, out_ref, *,
                          sz_b, seq_len, n_head, d_in):
    dv = d_in // n_head
    v2d = v2d_ref[...]
    attn = _fused_softmax(v2d, weff_ref[...], beff_ref[...],
                          sz_b=sz_b, seq_len=seq_len, n_head=n_head)   # (B, H, S)
    attn_ref[...] = attn.astype(attn_ref.dtype)
    v3 = v2d.reshape(sz_b, seq_len, d_in)               # leading-dim split only (free)
    for h in range(n_head):                             # static unroll, n_head is small
        a_h = attn[:, h:h + 1, :]                       # (B, 1, S)   sublane slice
        v_h = v3[:, :, h * dv:(h + 1) * dv]             # (B, S, dv)  lane slice
        o_h = jnp.einsum('bqs,bsd->bqd', a_h, v_h,
                         preferred_element_type=jnp.float32)   # (B, 1, dv) on the MXU
        out_ref[:, h:h + 1, :] = o_h.astype(out_ref.dtype)


def multi_head_attention_small(v, Q, Wk_weight, Wk_bias, *, n_head, d_k,
                               weight_v=False):
    """Pallas forward of MultiHeadAttentionSmall (pad_mask=None, return_comp=False).

    Returns attn of shape (n_head, sz_b, seq_len) when weight_v=False, or
    (output, attn) with output (n_head, sz_b, d_in // n_head) when weight_v=True.
    """
    sz_b, seq_len, d_in = v.shape
    assert d_in % n_head == 0
    dv = d_in // n_head
    temperature = float(np.power(d_k, 0.5))

    # Tiny one-off parameter fold (O(H*d_k*d_in)) done in XLA: fuse the per-head
    # key projection, the learned query and 1/temperature into one effective
    # (d_in, n_head) weight and a (1, n_head) bias.
    Wk_h = Wk_weight.reshape(n_head, d_k, d_in).astype(jnp.float32)
    bk_h = Wk_bias.reshape(n_head, d_k).astype(jnp.float32)
    Q_h = Q.astype(jnp.float32)                                      # (H, d_k)
    w_eff = jnp.einsum('hkd,hk->dh', Wk_h, Q_h) / temperature        # (d_in, H)
    b_eff = (jnp.sum(bk_h * Q_h, axis=1) / temperature)[None, :]     # (1, H)

    v2d = v.astype(jnp.float32).reshape(sz_b * seq_len, d_in)        # free reshape

    in_specs = [
        pl.BlockSpec((sz_b * seq_len, d_in), lambda i: (0, 0)),      # v (passed once)
        pl.BlockSpec((d_in, n_head), lambda i: (0, 0)),              # w_eff
        pl.BlockSpec((1, n_head), lambda i: (0, 0)),                 # b_eff
    ]
    compiler_params = pltpu.CompilerParams(dimension_semantics=("arbitrary",))

    if not weight_v:
        kernel = functools.partial(_attn_kernel, sz_b=sz_b, seq_len=seq_len,
                                   n_head=n_head)
        attn_bhs = pl.pallas_call(
            kernel,
            out_shape=jax.ShapeDtypeStruct((sz_b, n_head, seq_len), jnp.float32),
            grid_spec=pltpu.PrefetchScalarGridSpec(
                num_scalar_prefetch=0,
                grid=(1,),
                in_specs=in_specs,
                out_specs=pl.BlockSpec((sz_b, n_head, seq_len),
                                       lambda i: (0, 0, 0)),
            ),
            compiler_params=compiler_params,
        )(v2d, w_eff, b_eff)
        # Tiny head-major permute on the reduced attn tensor (layout plumbing).
        return jnp.transpose(attn_bhs, (1, 0, 2))                    # (H, B, S)

    kernel = functools.partial(_attn_weighted_kernel, sz_b=sz_b, seq_len=seq_len,
                               n_head=n_head, d_in=d_in)
    attn_bhs, out_bhd = pl.pallas_call(
        kernel,
        out_shape=(
            jax.ShapeDtypeStruct((sz_b, n_head, seq_len), jnp.float32),
            jax.ShapeDtypeStruct((sz_b, n_head, dv), jnp.float32),
        ),
        grid_spec=pltpu.PrefetchScalarGridSpec(
            num_scalar_prefetch=0,
            grid=(1,),
            in_specs=in_specs,
            out_specs=[
                pl.BlockSpec((sz_b, n_head, seq_len), lambda i: (0, 0, 0)),
                pl.BlockSpec((sz_b, n_head, dv), lambda i: (0, 0, 0)),
            ],
        ),
        compiler_params=compiler_params,
    )(v2d, w_eff, b_eff)
    return (jnp.transpose(out_bhd, (1, 0, 2)),                       # (H, B, dv)
            jnp.transpose(attn_bhs, (1, 0, 2)))                      # (H, B, S)


def _reference(v, Q, Wk_weight, Wk_bias, *, n_head, d_k, weight_v=False):
    """Pure-JAX mirror of the PyTorch forward (pad_mask=None, return_comp=False)."""
    sz_b, seq_len, d_in = v.shape
    dv = d_in // n_head
    k = v @ Wk_weight.T + Wk_bias                                    # (B, S, H*d_k)
    k = k.reshape(sz_b, seq_len, n_head, d_k)
    k = jnp.transpose(k, (2, 0, 1, 3)).reshape(n_head * sz_b, seq_len, d_k)
    q = jnp.stack([Q] * sz_b, axis=1).reshape(-1, d_k)               # (H*B, d_k)
    attn = jnp.einsum('nd,nsd->ns', q, k) / np.power(d_k, 0.5)       # (H*B, S)
    attn = jax.nn.softmax(attn, axis=-1).reshape(n_head, sz_b, seq_len)
    if not weight_v:
        return attn
    v_split = jnp.transpose(v.reshape(sz_b, seq_len, n_head, dv), (2, 0, 1, 3))
    out = jnp.einsum('hbs,hbsd->hbd', attn, v_split)                 # (H, B, dv)
    return out, attn


if __name__ == "__main__":
    # Small shapes consistent with the module: v is (sz_b, seq_len, d_in)
    n_head, d_k, d_in = 4, 8, 32
    sz_b, seq_len = 2, 8

    key = jax.random.PRNGKey(0)
    k_v, k_q, k_w, k_b = jax.random.split(key, 4)

    v = jax.random.normal(k_v, (sz_b, seq_len, d_in), dtype=jnp.float32)

    # Deterministic parameter init mirroring the module's __init__:
    #   Q, fc1_k.weight ~ Normal(0, sqrt(2/d_k)); fc1_k.bias ~ U(-1/sqrt(d_in), 1/sqrt(d_in))
    std = float(np.sqrt(2.0 / d_k))
    Q = jax.random.normal(k_q, (n_head, d_k), dtype=jnp.float32) * std
    Wk_weight = jax.random.normal(k_w, (n_head * d_k, d_in), dtype=jnp.float32) * std
    bound = float(1.0 / np.sqrt(d_in))
    Wk_bias = jax.random.uniform(k_b, (n_head * d_k,), dtype=jnp.float32,
                                 minval=-bound, maxval=bound)

    # Default path (weight_v=False): attention weights only.
    attn = multi_head_attention_small(v, Q, Wk_weight, Wk_bias,
                                      n_head=n_head, d_k=d_k, weight_v=False)
    attn = jax.block_until_ready(attn)
    ref_attn = _reference(v, Q, Wk_weight, Wk_bias, n_head=n_head, d_k=d_k)
    # Tolerance slightly looser than raw f32: the fused projection changes the fp
    # accumulation order and the softmax denom uses EUP rcp + one Newton step.
    np.testing.assert_allclose(np.asarray(attn), np.asarray(ref_attn),
                               rtol=1e-4, atol=1e-6)

    # weight_v=True path: attention-weighted values + attention weights.
    out, attn_w = multi_head_attention_small(v, Q, Wk_weight, Wk_bias,
                                             n_head=n_head, d_k=d_k, weight_v=True)
    out = jax.block_until_ready(out)
    ref_out, ref_attn_w = _reference(v, Q, Wk_weight, Wk_bias,
                                     n_head=n_head, d_k=d_k, weight_v=True)
    np.testing.assert_allclose(np.asarray(attn_w), np.asarray(ref_attn_w),
                               rtol=1e-4, atol=1e-6)
    np.testing.assert_allclose(np.asarray(out), np.asarray(ref_out),
                               rtol=1e-4, atol=1e-5)

    print("KERNEL_OK")
</pallas_src>

<mosaic_0001>
module attributes {stable_mosaic.version = 11 : i64} {
  func.func @_attn_kernel(%arg0: i32, %arg1: memref<16x32xf32, #tpu.memory_space<vmem>>, %arg2: memref<32x4xf32, #tpu.memory_space<vmem>>, %arg3: memref<1x4xf32, #tpu.memory_space<vmem>>, %arg4: memref<2x4x8xf32, #tpu.memory_space<vmem>>) attributes {dimension_semantics = [#tpu.dimension_semantics<arbitrary>], iteration_bounds = array<i64: 1>, scalar_prefetch = 0 : i64, scratch_operands = 0 : i64, tpu.core_type = #tpu.core_type<tc>, window_params = [{pipeline_mode = #tpu.pipeline_mode<synchronous>, transform_indices = @transform_0, window_bounds = array<i64: 16, 32>}, {pipeline_mode = #tpu.pipeline_mode<synchronous>, transform_indices = @transform_1, window_bounds = array<i64: 32, 4>}, {pipeline_mode = #tpu.pipeline_mode<synchronous>, transform_indices = @transform_2, window_bounds = array<i64: 1, 4>}, {pipeline_mode = #tpu.pipeline_mode<synchronous>, transform_indices = @transform_3, window_bounds = array<i64: 2, 4, 8>}]} {
    %c0 = arith.constant 0 : index
    %c0_0 = arith.constant 0 : index
    %0 = vector.load %arg1[%c0, %c0_0] : memref<16x32xf32, #tpu.memory_space<vmem>>, vector<16x32xf32>
    %c0_1 = arith.constant 0 : index
    %c0_2 = arith.constant 0 : index
    %1 = vector.load %arg2[%c0_1, %c0_2] : memref<32x4xf32, #tpu.memory_space<vmem>>, vector<32x4xf32>
    %c0_3 = arith.constant 0 : index
    %c0_4 = arith.constant 0 : index
    %2 = vector.load %arg3[%c0_3, %c0_4] : memref<1x4xf32, #tpu.memory_space<vmem>>, vector<1x4xf32>
    %cst = arith.constant dense<0.000000e+00> : vector<16x4xf32>
    %3 = tpu.matmul %0, %1, %cst {dimension_numbers = #tpu.dot_dimension_numbers<[1], [0], [0], [1], [0, 0, 1, 1], [], []>} : vector<16x32xf32>, vector<32x4xf32>, vector<16x4xf32> -> vector<16x4xf32>
    %4 = vector.broadcast %2 : vector<1x4xf32> to vector<16x4xf32>
    %5 = arith.addf %3, %4 : vector<16x4xf32>
    %6 = vector.shape_cast %5 : vector<16x4xf32> to vector<2x8x4xf32>
    %cst_5 = arith.constant dense<0xFF800000> : vector<2x4xf32>
    %7 = vector.multi_reduction <maximumf>, %6, %cst_5 [1] : vector<2x8x4xf32> to vector<2x4xf32>
    %8 = vector.shape_cast %7 : vector<2x4xf32> to vector<2x1x4xf32>
    %9 = vector.broadcast %8 : vector<2x1x4xf32> to vector<2x8x4xf32>
    %10 = arith.subf %6, %9 : vector<2x8x4xf32>
    %11 = math.exp %10 : vector<2x8x4xf32>
    %cst_6 = arith.constant dense<0.000000e+00> : vector<2x4xf32>
    %12 = vector.multi_reduction <add>, %11, %cst_6 [1] : vector<2x8x4xf32> to vector<2x4xf32>
    %13 = vector.shape_cast %12 : vector<2x4xf32> to vector<2x1x4xf32>
    %14 = tpu.reciprocal %13 {approx = true} : vector<2x1x4xf32> -> vector<2x1x4xf32>
    %15 = arith.mulf %13, %14 : vector<2x1x4xf32>
    %cst_7 = arith.constant 2.000000e+00 : f32
    %16 = vector.broadcast %cst_7 : f32 to vector<2x1x4xf32>
    %17 = arith.subf %16, %15 : vector<2x1x4xf32>
    %18 = arith.mulf %14, %17 : vector<2x1x4xf32>
    %19 = vector.broadcast %18 : vector<2x1x4xf32> to vector<2x8x4xf32>
    %20 = arith.mulf %11, %19 : vector<2x8x4xf32>
    %21 = tpu.transpose %20, [0, 2, 1] : vector<2x8x4xf32> -> vector<2x4x8xf32>
    %c0_8 = arith.constant 0 : index
    %c0_9 = arith.constant 0 : index
    %c0_10 = arith.constant 0 : index
    %22 = vector.load %arg4[%c0_8, %c0_9, %c0_10] : memref<2x4x8xf32, #tpu.memory_space<vmem>>, vector<2x4x8xf32>
    tpu.vector_store %arg4[%c0_8, %c0_9, %c0_10], %21 {strides = array<i32>} : memref<2x4x8xf32, #tpu.memory_space<vmem>>, vector<2x4x8xf32>,
    return
  }
  func.func @transform_0(%arg0: i32) -> (i32, i32) {
    %c0_i32 = arith.constant 0 : i32
    %c0_i32_0 = arith.constant 0 : i32
    %c0_i32_1 = arith.constant 0 : i32
    return %c0_i32, %c0_i32_0 : i32, i32
  }
  func.func @transform_1(%arg0: i32) -> (i32, i32) {
    %c0_i32 = arith.constant 0 : i32
    %c0_i32_0 = arith.constant 0 : i32
    %c0_i32_1 = arith.constant 0 : i32
    return %c0_i32, %c0_i32_0 : i32, i32
  }
  func.func @transform_2(%arg0: i32) -> (i32, i32) {
    %c0_i32 = arith.constant 0 : i32
    %c0_i32_0 = arith.constant 0 : i32
    %c0_i32_1 = arith.constant 0 : i32
    return %c0_i32, %c0_i32_0 : i32, i32
  }
  func.func @transform_3(%arg0: i32) -> (i32, i32, i32) {
    %c0_i32 = arith.constant 0 : i32
    %c0_i32_0 = arith.constant 0 : i32
    %c0_i32_1 = arith.constant 0 : i32
    %c0_i32_2 = arith.constant 0 : i32
    return %c0_i32, %c0_i32_0, %c0_i32_1 : i32, i32, i32
  }
}

</mosaic_0001>

<bundles_post_ra>
// kernel: tpu_custom_call.1
= control target key start
LH: loop header
LB: loop body
LE: loop exit
PB: predicated region body
PF: predicated region fallthrough
CT: control target
= control target key end

     0   :  { %s281_s0 = inlined_call_operand.vmem [shape: f32[16,32], index: 0, kind: input, shape index: {}]   ;;  %s282_s1 = inlined_call_operand.vmem [shape: f32[32,4], index: 1, kind: input, shape index: {}]   ;;  %s283_s2 = inlined_call_operand.vmem [shape: f32[1,4], index: 2, kind: input, shape index: {}]   ;;  %s284_s3 = inlined_call_operand.hbm [shape: f32[2,4,8], index: 3, kind: output, shape index: {}]  }
   0x1   :  { %v20_v0 = vld [vmem:[%s282_s1 + $0x18] sm:$0xff]  ;;  %v19_v1 = vld [vmem:[%s282_s1 + $0x10] sm:$0xff]  ;;  %v18_v2 = vld [vmem:[%s282_s1 + $0x8] sm:$0xff] }
   0x2   :  { %44 = vmatpush.msra.mxu0 %v20_v0  ;;  %187 = vmatpush.msra.mxu1 %v20_v0 }
   0x3   :  { %8 = vsyncpa [#allocation3], 0  ;;  %v17_v3 = vld [vmem:[%s282_s1] sm:$0xff]  ;;  %vm25_vm0 = vcmask 261120   ;;  %v16_v5 = vld [vmem:[%s281_s0 + $0x8] sm:$0xff]  ;;  %vm55_vm1 = vcmask 31744  }
   0x4   :  { %45 = vmatpush.msra.mxu0 %v19_v1  ;;  %188 = vmatpush.msra.mxu1 %v19_v1  ;;  %v15_v4 = vld [vmem:[%s281_s0] sm:$0xff]  ;;  %vm164_vm2 = vcmask 60416   ;;  %s230_s0 = smov [#allocation2]   ;;  %s173_s27 = sshll.u32 %s284_s3, 4  ;;  %s174_s27 = int_to_ptr.hbm [resolvable:$true] %s173_s27 }
   0x5   :  { %v195_v6 = vld [vmem:[%s283_s2] ss:$0 sm:$0xff]  ;;  %s171_s1 = sshll.u32 %s230_s0, 4  ;;  %s231_s28 = smov 64   ;;  %s172_s1 = int_to_ptr.vmem [resolvable:$true] %s171_s1 }
   0x6   :  { %46 = vmatpush.msra.mxu0 %v18_v2  ;;  %189 = vmatpush.msra.mxu1 %v18_v2  ;;  %s232_s29 = smov 4  }
   0x8   :  { %47 = vmatpush.msra.mxu0 %v17_v3  ;;  %190 = vmatpush.msra.mxu1 %v17_v3 }
   0x9   :  { %185 = vmatmul.msk.f32.vlgmr.msra.gmra.mxu0 %vm25_vm0, %v15_v4  ;;  %186 = vmatmul.msk.f32.vlgmr.msra.gmra.mxu1 %vm25_vm0, %v16_v5 }
  0x86   :  { %v49_v7 = vpop.f32.mrf.mxu0  ;;  %v52_v8 = vpop.f32.mrf.mxu1 }
  0x87   :  { %v50_v9 = vadd.f32 %v195_v6, %v49_v7  ;;  %v53_v10 = vadd.f32 %v195_v6, %v52_v8 }
  0x89   :  { %v56_v11 = vsel %vm55_vm1, %v50_v9, -inf  ;;  %v63_v12 = vsel %vm55_vm1, %v53_v10, -inf }
  0x8a   :  { %v57_v13 = vrot.slane %v56_v11, 4  ;;  %v64_v14 = vrot.slane %v63_v12, 4 }
  0x8c   :  { %v58_v15 = vmax.f32 %v56_v11, %v57_v13  ;;  %v65_v16 = vmax.f32 %v63_v12, %v64_v14 }
  0x8e   :  { %v59_v17 = vrot.slane %v58_v15, 2  ;;  %v66_v18 = vrot.slane %v65_v16, 2 }
  0x90   :  { %v60_v19 = vmax.f32 %v58_v15, %v59_v17  ;;  %v67_v20 = vmax.f32 %v65_v16, %v66_v18 }
  0x92   :  { %v61_v21 = vrot.slane %v60_v19, 1  ;;  %v68_v22 = vrot.slane %v67_v20, 1 }
  0x94   :  { %v62_v23 = vmax.f32 %v60_v19, %v61_v21  ;;  %v69_v24 = vmax.f32 %v67_v20, %v68_v22 }
  0x96   :  { %v70_v25 = vsub.f32 %v50_v9, %v62_v23  ;;  %v71_v26 = vsub.f32 %v53_v10, %v69_v24 }
  0x98   :  { %v72_v27 = vmul.f32 1.442695, %v70_v25  ;;  %v74_v28 = vmul.f32 1.442695, %v71_v26 }
  0x9a   :  { %196 = vpow2.f32 %v72_v27 }
  0x9b   :  { %198 = vpow2.f32 %v74_v28 }
  0xa0   :  { %v197_v29 = vpop.eup %196 }
  0xa1   :  { %v199_v30 = vpop.eup %198  ;;  %v76_v31 = vsel %vm55_vm1, %v197_v29, 0.0 }
  0xa2   :  { %v77_v32 = vrot.slane %v76_v31, 4  ;;  %v83_v33 = vsel %vm55_vm1, %v199_v30, 0.0 }
  0xa3   :  { %v84_v34 = vrot.slane %v83_v33, 4 }
  0xa4   :  { %v78_v35 = vadd.f32 %v77_v32, %v76_v31 }
  0xa5   :  { %v85_v36 = vadd.f32 %v84_v34, %v83_v33 }
  0xa6   :  { %v79_v37 = vrot.slane %v78_v35, 2 }
  0xa7   :  { %v86_v38 = vrot.slane %v85_v36, 2 }
  0xa8   :  { %v80_v39 = vadd.f32 %v79_v37, %v78_v35 }
  0xa9   :  { %v87_v40 = vadd.f32 %v86_v38, %v85_v36 }
  0xaa   :  { %v81_v41 = vrot.slane %v80_v39, 1 }
  0xab   :  { %v88_v42 = vrot.slane %v87_v40, 1 }
  0xac   :  { %v82_v43 = vadd.f32 %v81_v41, %v80_v39 }
  0xad   :  { %v89_v44 = vadd.f32 %v88_v42, %v87_v40 }
  0xae   :  { %200 = vrcp.f32 %v82_v43 }
  0xaf   :  { %202 = vrcp.f32 %v89_v44 }
  0xb4   :  { %v201_v45 = vpop.eup %200 }
  0xb5   :  { %v203_v46 = vpop.eup %202  ;;  %v92_v47 = vmul.f32 %v201_v45, %v82_v43 }
  0xb6   :  { %v93_v49 = vmul.f32 %v203_v46, %v89_v44 }
  0xb7   :  { %v94_v48 = vsub.f32 2.0, %v92_v47 }
  0xb8   :  { %v95_v52 = vsub.f32 2.0, %v93_v49 }
  0xb9   :  { %v96_v50 = vmul.f32 %v201_v45, %v94_v48 }
  0xba   :  { %v97_v53 = vmul.f32 %v203_v46, %v95_v52 }
  0xbb   :  { %v98_v51 = vmul.f32 %v197_v29, %v96_v50 }
  0xbc   :  { %v99_v54 = vmul.f32 %v199_v30, %v97_v53 }
  0xbd   :  { %100 = vxpose.xlu0.b32.start.end [1/1] (short) (narrow) %v98_v51, 8 }
  0xc5   :  { %132 = vxpose.xlu0.b32.start.end [1/1] (short) (narrow) %v99_v54, 8 }
 0x161   :  { %v116_v55 = vpop.trf.xlu0 }
 0x162   :  { %165 = vst.msk [vmem:[#allocation2] sm:$0xf] %vm164_vm2, %v116_v55 }
 0x169   :  { %v148_v56 = vpop.trf.xlu0 }
 0x16a   :  { %166 = vst.msk [vmem:[#allocation2 + $0x4] sm:$0xf] %vm164_vm2, %v148_v56 }
 0x16b   :  { %179 = dma.vmem_to_hbm [thread:$0]  %s172_s1, 128, %s174_s27, [#allocation3], %s231_s28, %s231_s28, %s232_s29  }
 0x16c   :  { %228 = dma.done.wait [#allocation3], 128  }
 0x16d   :  { %229 = vsyncadd [#allocation3], 4294967168 }
 0x16e   :  { %184 = vsyncpa [#allocation3], 1 }

</bundles_post_ra>
